<compile_context>
chip_gen: v5e
topology: v5e:2x2
jax: 0.10.0
libtpu: 0.0.40
codegen_flags: <defaults>
</compile_context>

<pallas_src>
import jax
import jax.numpy as jnp
from jax.experimental import pallas as pl
from jax.experimental.pallas import tpu as pltpu


def _node_info_score_kernel(src_norm_ref, dst_norm_ref, adj_ref, e_ref,
                            feat_src_ref, feat_dst_ref, score_ref, acc_ref):
    k = pl.program_id(1)          # src / contraction tile index (last grid axis)

    @pl.when(k == 0)
    def _zero():
        acc_ref[...] = jnp.zeros_like(acc_ref)

    # adj already has its self-loop diagonal zeroed in the wrapper and is an exact
    # 0/1 int8 mask, e is bf16 -> the product is exactly representable in bf16.
    # Do the elementwise multiply in f32 (portable; v5e has no bf16 VALU) and cast
    # only the MXU operands to bf16; accumulate in f32.
    ae = (adj_ref[...].astype(jnp.float32) *
          e_ref[...].astype(jnp.float32)).astype(jnp.bfloat16)           # (Ti, Tk)
    feat_src = (feat_src_ref[...] * src_norm_ref[...]).astype(jnp.bfloat16)  # (Tk, D)

    acc_ref[...] += jnp.dot(ae, feat_src, preferred_element_type=jnp.float32)

    # Finalize once every src tile has been accumulated for this dst tile.
    @pl.when(k == pl.num_programs(1) - 1)
    def _finalize():
        out = feat_dst_ref[...] - acc_ref[...] * dst_norm_ref[...]
        # TODO(synk): lane-dense (1, Ti) output layout would avoid masked partial
        # stores here; low value since the total output is only N floats.
        score_ref[...] = jnp.sum(jnp.abs(out), axis=1, keepdims=True)


def _largest_divisor_tile(n, cap):
    for t in (2048, 1024, 512, 256, 128):
        if t <= cap and n % t == 0:
            return t
    # TODO(synk): pad + mask ragged N instead of falling back to one full-width tile.
    return n


def _pick_tiles(n):
    # Contraction tile: as large as possible (big DMAs, fewer ~600-cycle grid steps,
    # fewer re-reads of feat_src).  Actual double-buffered footprint at Ti=512,
    # Tk=2048 is ~7 MiB: comfortably inside even v7x's 32 MiB default scoped VMEM.
    tile_k = _largest_divisor_tile(n, 2048)
    # Dst-row tile: keep >= 2 tiles along the "parallel" axis so both TensorCores
    # on v7x stay busy; otherwise one core idles (up to 2x loss).
    tile_i = _largest_divisor_tile(n, 512)
    while tile_i > 128 and (n // tile_i) < 2 and n % (tile_i // 2) == 0:
        tile_i //= 2
    return tile_i, tile_k


def node_info_score(feat, adj, e_feat, *, sym_norm: bool = True,
                    tile_i: int | None = None, tile_k: int | None = None):
    """Pallas implementation of NodeInfoScoreLayer.forward on a dense graph.

    `adj` may be bool / int8 / float (0/1 mask, self-loops included).  `e_feat`
    may be f32 or bf16; it is streamed to the kernel as bf16 (documented numerics
    change vs. a pure-f32 reference, ~1e-2 relative).
    """
    N, D = feat.shape
    assert adj.shape == (N, N) and e_feat.shape == (N, N)

    auto_i, auto_k = _pick_tiles(N)
    tile_i = auto_i if tile_i is None else tile_i
    tile_k = auto_k if tile_k is None else tile_k
    assert N % tile_i == 0 and N % tile_k == 0, "N must be divisible by the tile sizes"
    nt_i, nt_k = N // tile_i, N // tile_k

    # Narrow the 0/1 adjacency mask to int8 once (no-op if already int8/bool-sized)
    # and compute the degrees from that 1-byte copy -- this replaces the two f32
    # (N,N) reduction passes that previously rivaled the kernel's own HBM traffic.
    # Degrees are on the ORIGINAL (self-loop-included) adjacency, like DGL.
    adj_i8 = adj.astype(jnp.int8)
    in_deg = jnp.sum(adj_i8, axis=1, dtype=jnp.float32, keepdims=True)   # (N,1) per dst
    out_deg = jnp.sum(adj_i8, axis=0, dtype=jnp.float32)[:, None]        # (N,1) per src
    if sym_norm:
        src_norm = jax.lax.rsqrt(jnp.maximum(out_deg, 1.0))
        dst_norm = jax.lax.rsqrt(jnp.maximum(in_deg, 1.0))
    else:
        src_norm = jnp.ones_like(out_deg)
        dst_norm = 1.0 / jnp.maximum(in_deg, 1.0)

    # Self-loop removal fused into the int8 mask (so the kernel needs no diagonal
    # branch).  Degrees above were taken before this.
    row = jax.lax.broadcasted_iota(jnp.int32, (N, N), 0)
    col = jax.lax.broadcasted_iota(jnp.int32, (N, N), 1)
    adj_noself = jnp.where(row == col, jnp.int8(0), adj_i8)

    # Largest HBM stream: make sure edge weights reach the kernel as bf16.
    e_bf16 = e_feat.astype(jnp.bfloat16)

    out = pl.pallas_call(
        _node_info_score_kernel,
        out_shape=jax.ShapeDtypeStruct((N, 1), jnp.float32),
        grid=(nt_i, nt_k),
        in_specs=[
            pl.BlockSpec((tile_k, 1), lambda i, k: (k, 0)),        # src_norm (per src)
            pl.BlockSpec((tile_i, 1), lambda i, k: (i, 0)),        # dst_norm (per dst)
            pl.BlockSpec((tile_i, tile_k), lambda i, k: (i, k)),   # adjacency (int8, no self-loops)
            pl.BlockSpec((tile_i, tile_k), lambda i, k: (i, k)),   # edge weights (bf16)
            pl.BlockSpec((tile_k, D), lambda i, k: (k, 0)),        # feat, src side
            pl.BlockSpec((tile_i, D), lambda i, k: (i, 0)),        # feat, dst side
        ],
        out_specs=pl.BlockSpec((tile_i, 1), lambda i, k: (i, 0)),
        scratch_shapes=[pltpu.VMEM((tile_i, D), jnp.float32)],
        compiler_params=pltpu.CompilerParams(
            dimension_semantics=("parallel", "arbitrary"),
        ),
    )(src_norm, dst_norm, adj_noself, e_bf16, feat, feat)
    return out[:, 0]


def _reference(feat, adj, e_feat, *, sym_norm: bool = True):
    """Pure-JAX reference mirroring the PyTorch/DGL semantics (f32 math)."""
    feat = feat.astype(jnp.float32)
    adj = adj.astype(jnp.float32)
    e = e_feat.astype(jnp.float32)
    N = adj.shape[0]
    in_deg = jnp.sum(adj, axis=1, keepdims=True)
    out_deg = jnp.sum(adj, axis=0)[:, None]
    a = (adj * e) * (1.0 - jnp.eye(N, dtype=jnp.float32))
    if sym_norm:
        src_norm = jax.lax.rsqrt(jnp.maximum(out_deg, 1.0))
        dst_norm = jax.lax.rsqrt(jnp.maximum(in_deg, 1.0))
        out = feat - (a @ (feat * src_norm)) * dst_norm
    else:
        dst_norm = 1.0 / jnp.maximum(in_deg, 1.0)
        out = feat - dst_norm * (a @ feat)
    return jnp.sum(jnp.abs(out), axis=1)


if __name__ == "__main__":
    key = jax.random.PRNGKey(0)
    k_feat, k_adj, k_e = jax.random.split(key, 3)

    # 256 nodes, 32-dim features -> auto tiles (Ti=128, Tk=256), grid (2, 1):
    # exercises the resident accumulator, the pipelined reduction axis and the
    # parallel dst-row axis.
    N, D = 256, 32

    feat = jax.random.normal(k_feat, (N, D), dtype=jnp.float32)

    # Random graph (~10% density) plus explicit self-loops, supplied as a bool mask
    # (exercises the narrow-adjacency API path).
    adj = (jax.random.uniform(k_adj, (N, N)) < 0.1) | jnp.eye(N, dtype=bool)

    # Edge weights supplied in bf16 (narrow HBM traffic).
    e_feat = jax.random.normal(k_e, (N, N), dtype=jnp.float32).astype(jnp.bfloat16)

    for sym_norm in (True, False):
        score = node_info_score(feat, adj, e_feat, sym_norm=sym_norm)
        score = jax.block_until_ready(score)
        ref = _reference(feat, adj, e_feat, sym_norm=sym_norm)
        assert score.shape == (N,)
        # bf16 MXU operands (feat_src cast + bf16 dot) vs f32 reference: ~1e-2 rel.
        assert jnp.allclose(score, ref, atol=5e-2, rtol=1e-2), (sym_norm, score, ref)

    print("KERNEL_OK")
</pallas_src>

<mosaic_0001>
module attributes {stable_mosaic.version = 11 : i64} {
  func.func @_node_info_score_kernel(%arg0: i32, %arg1: i32, %arg2: memref<256x1xf32, #tpu.memory_space<vmem>>, %arg3: memref<128x1xf32, #tpu.memory_space<vmem>>, %arg4: memref<128x256xi8, #tpu.memory_space<vmem>>, %arg5: memref<128x256xbf16, #tpu.memory_space<vmem>>, %arg6: memref<256x32xf32, #tpu.memory_space<vmem>>, %arg7: memref<128x32xf32, #tpu.memory_space<vmem>>, %arg8: memref<128x1xf32, #tpu.memory_space<vmem>>, %arg9: memref<128x32xf32, #tpu.memory_space<vmem>>) attributes {dimension_semantics = [#tpu.dimension_semantics<parallel>, #tpu.dimension_semantics<arbitrary>], iteration_bounds = array<i64: 2, 1>, scalar_prefetch = 0 : i64, scratch_operands = 1 : i64, tpu.core_type = #tpu.core_type<tc>, window_params = [{transform_indices = @transform_0, window_bounds = array<i64: 256, 1>}, {transform_indices = @transform_1, window_bounds = array<i64: 128, 1>}, {transform_indices = @transform_2, window_bounds = array<i64: 128, 256>}, {transform_indices = @transform_3, window_bounds = array<i64: 128, 256>}, {transform_indices = @transform_4, window_bounds = array<i64: 256, 32>}, {transform_indices = @transform_5, window_bounds = array<i64: 128, 32>}, {transform_indices = @transform_6, window_bounds = array<i64: 128, 1>}]} {
    %c0_i32 = arith.constant 0 : i32
    %0 = arith.cmpi eq, %arg1, %c0_i32 : i32
    %1 = arith.extui %0 : i1 to i32
    %c0_i32_0 = arith.constant 0 : i32
    %2 = arith.cmpi ne, %1, %c0_i32_0 : i32
    scf.if %2 {
      %cst_14 = arith.constant 0.000000e+00 : f32
      %21 = vector.broadcast %cst_14 : f32 to vector<128x32xf32>
      %c0_15 = arith.constant 0 : index
      %c0_16 = arith.constant 0 : index
      %22 = vector.load %arg9[%c0_15, %c0_16] : memref<128x32xf32, #tpu.memory_space<vmem>>, vector<128x32xf32>
      tpu.vector_store %arg9[%c0_15, %c0_16], %21 {strides = array<i32>} : memref<128x32xf32, #tpu.memory_space<vmem>>, vector<128x32xf32>,
    } else {
    }
    %c0 = arith.constant 0 : index
    %c0_1 = arith.constant 0 : index
    %3 = vector.load %arg4[%c0, %c0_1] : memref<128x256xi8, #tpu.memory_space<vmem>>, vector<128x256xi8>
    %4 = arith.sitofp %3 : vector<128x256xi8> to vector<128x256xf32>
    %c0_2 = arith.constant 0 : index
    %c0_3 = arith.constant 0 : index
    %5 = vector.load %arg5[%c0_2, %c0_3] : memref<128x256xbf16, #tpu.memory_space<vmem>>, vector<128x256xbf16>
    %6 = arith.extf %5 : vector<128x256xbf16> to vector<128x256xf32>
    %7 = arith.mulf %4, %6 : vector<128x256xf32>
    %8 = arith.truncf %7 : vector<128x256xf32> to vector<128x256xbf16>
    %c0_4 = arith.constant 0 : index
    %c0_5 = arith.constant 0 : index
    %9 = vector.load %arg6[%c0_4, %c0_5] : memref<256x32xf32, #tpu.memory_space<vmem>>, vector<256x32xf32>
    %c0_6 = arith.constant 0 : index
    %c0_7 = arith.constant 0 : index
    %10 = vector.load %arg2[%c0_6, %c0_7] : memref<256x1xf32, #tpu.memory_space<vmem>>, vector<256x1xf32>
    %11 = vector.broadcast %10 : vector<256x1xf32> to vector<256x32xf32>
    %12 = arith.mulf %9, %11 : vector<256x32xf32>
    %13 = arith.truncf %12 : vector<256x32xf32> to vector<256x32xbf16>
    %c0_8 = arith.constant 0 : index
    %c0_9 = arith.constant 0 : index
    %14 = vector.load %arg9[%c0_8, %c0_9] : memref<128x32xf32, #tpu.memory_space<vmem>>, vector<128x32xf32>
    %cst = arith.constant dense<0.000000e+00> : vector<128x32xf32>
    %15 = tpu.matmul %8, %13, %cst {dimension_numbers = #tpu.dot_dimension_numbers<[1], [0], [0], [1], [0, 0, 1, 1], [], []>} : vector<128x256xbf16>, vector<256x32xbf16>, vector<128x32xf32> -> vector<128x32xf32>
    %16 = arith.addf %14, %15 : vector<128x32xf32>
    %c0_10 = arith.constant 0 : index
    %c0_11 = arith.constant 0 : index
    %17 = vector.load %arg9[%c0_10, %c0_11] : memref<128x32xf32, #tpu.memory_space<vmem>>, vector<128x32xf32>
    tpu.vector_store %arg9[%c0_10, %c0_11], %16 {strides = array<i32>} : memref<128x32xf32, #tpu.memory_space<vmem>>, vector<128x32xf32>,
    %c0_i32_12 = arith.constant 0 : i32
    %18 = arith.cmpi eq, %arg1, %c0_i32_12 : i32
    %19 = arith.extui %18 : i1 to i32
    %c0_i32_13 = arith.constant 0 : i32
    %20 = arith.cmpi ne, %19, %c0_i32_13 : i32
    scf.if %20 {
      %c0_14 = arith.constant 0 : index
      %c0_15 = arith.constant 0 : index
      %21 = vector.load %arg7[%c0_14, %c0_15] : memref<128x32xf32, #tpu.memory_space<vmem>>, vector<128x32xf32>
      %c0_16 = arith.constant 0 : index
      %c0_17 = arith.constant 0 : index
      %22 = vector.load %arg9[%c0_16, %c0_17] : memref<128x32xf32, #tpu.memory_space<vmem>>, vector<128x32xf32>
      %c0_18 = arith.constant 0 : index
      %c0_19 = arith.constant 0 : index
      %23 = vector.load %arg3[%c0_18, %c0_19] : memref<128x1xf32, #tpu.memory_space<vmem>>, vector<128x1xf32>
      %24 = vector.broadcast %23 : vector<128x1xf32> to vector<128x32xf32>
      %25 = arith.mulf %22, %24 : vector<128x32xf32>
      %26 = arith.subf %21, %25 : vector<128x32xf32>
      %27 = math.absf %26 : vector<128x32xf32>
      %cst_20 = arith.constant dense<0.000000e+00> : vector<128xf32>
      %28 = vector.multi_reduction <add>, %27, %cst_20 [1] : vector<128x32xf32> to vector<128xf32>
      %29 = vector.shape_cast %28 : vector<128xf32> to vector<128x1xf32>
      %c0_21 = arith.constant 0 : index
      %c0_22 = arith.constant 0 : index
      %30 = vector.load %arg8[%c0_21, %c0_22] : memref<128x1xf32, #tpu.memory_space<vmem>>, vector<128x1xf32>
      tpu.vector_store %arg8[%c0_21, %c0_22], %29 {strides = array<i32>} : memref<128x1xf32, #tpu.memory_space<vmem>>, vector<128x1xf32>,
    } else {
    }
    return
  }
  func.func @transform_0(%arg0: i32, %arg1: i32) -> (i32, i32) {
    %c0_i32 = arith.constant 0 : i32
    %c0_i32_0 = arith.constant 0 : i32
    return %arg1, %c0_i32 : i32, i32
  }
  func.func @transform_1(%arg0: i32, %arg1: i32) -> (i32, i32) {
    %c0_i32 = arith.constant 0 : i32
    %c0_i32_0 = arith.constant 0 : i32
    return %arg0, %c0_i32 : i32, i32
  }
  func.func @transform_2(%arg0: i32, %arg1: i32) -> (i32, i32) {
    %c0_i32 = arith.constant 0 : i32
    return %arg0, %arg1 : i32, i32
  }
  func.func @transform_3(%arg0: i32, %arg1: i32) -> (i32, i32) {
    %c0_i32 = arith.constant 0 : i32
    return %arg0, %arg1 : i32, i32
  }
  func.func @transform_4(%arg0: i32, %arg1: i32) -> (i32, i32) {
    %c0_i32 = arith.constant 0 : i32
    %c0_i32_0 = arith.constant 0 : i32
    return %arg1, %c0_i32 : i32, i32
  }
  func.func @transform_5(%arg0: i32, %arg1: i32) -> (i32, i32) {
    %c0_i32 = arith.constant 0 : i32
    %c0_i32_0 = arith.constant 0 : i32
    return %arg0, %c0_i32 : i32, i32
  }
  func.func @transform_6(%arg0: i32, %arg1: i32) -> (i32, i32) {
    %c0_i32 = arith.constant 0 : i32
    %c0_i32_0 = arith.constant 0 : i32
    return %arg0, %c0_i32 : i32, i32
  }
}

</mosaic_0001>

<bundles_post_ra>
// kernel: tpu_custom_call.1
= control target key start
LH: loop header
LB: loop body
LE: loop exit
PB: predicated region body
PF: predicated region fallthrough
CT: control target
= control target key end

     0   :  { %s1539_s21 = smov 0   ;;  %s1541_s22 = smov 0   ;;  %s2012_s0 = inlined_call_operand.vmem [shape: f32[256,1], index: 0, kind: input, shape index: {}]   ;;  %s2013_s1 = inlined_call_operand.vmem [shape: f32[256,1], index: 1, kind: input, shape index: {}]   ;;  %s2014_s2 = inlined_call_operand.vmem [shape: s8[256,256], index: 2, kind: input, shape index: {}]   ;;  %s2015_s3 = inlined_call_operand.vmem [shape: bf16[256,256], index: 3, kind: input, shape index: {}]   ;;  %s2016_s4 = inlined_call_operand.vmem [shape: f32[256,32], index: 4, kind: input, shape index: {}]   ;;  %s2017_s5 = inlined_call_operand.vmem [shape: f32[256,32], index: 5, kind: input, shape index: {}]   ;;  %s2018_s6 = inlined_call_operand.vmem [shape: f32[256,1], index: 6, kind: output, shape index: {}]  }
   0x1   :  { %s1543_s23 = smov 0  }
   0x2 LB: > { %s28_s24 = sadd.s32 1, %s1496_s22  ;;  %p1416_p0 = scmp.ge.s32.totalorder %s1500_s23, 1  ;;  %s1500_s23 = sphi %s1543_s23, %s16_s23   ;;  %s1496_s22 = sphi %s1541_s22, %s2020_s22   ;;  %s1492_s21 = sphi %s1539_s21, %s2019_s21  }
   0x3   : > { %p30_p1 = scmp.ge.s32.totalorder %s28_s24, 2  ;;  %p296_p2 = scmp.lt.s32.totalorder %s1500_s23, 3 }
   0x5   : > { %s2022_s24 = smov (%p30_p1, %s28_s24), 0  ;;  %p297_p3 = pnand %p1416_p0, %p296_p2 }
   0x6   : > { %s1417_s9 = sshll.u32 (!%p297_p3), %s1492_s21, 4  ;;  %s1419_s19 = sshll.u32 (!%p297_p3), %s1492_s21, 2 }
   0x7   : > { %300 = sbr.rel (%p297_p3) target bundleno = 544 (0x220), region = 44  ;;  %p368_p4 = scmp.lt.s32.totalorder (!%p297_p3), %s1417_s9, 31 }
   0x8   : > { %p375_p5 = scmp.lt.s32.totalorder (!%p297_p3), %s1419_s19, 7 }
   0xc   : > { %v640_v0 = vld [vmem:[%s2012_s0 + $0x20] sm:$0xff]  ;;  %v638_v1 = vld [vmem:[%s2012_s0 + $0x10] sm:$0xff]  ;;  %v1502_v3 = vmov 0   ;;  %v639_v5 = vld [vmem:[%s2012_s0 + $0x18] sm:$0xff]  ;;  %s2024_s9 = smov (!%p368_p4, %s1417_s9), 31  ;;  %s2026_s19 = smov (!%p375_p5, %s1419_s19), 7 }
   0xd   : > { %v636_v2 = vld [vmem:[%s2012_s0] sm:$0xff]  ;;  %1477 = vset.pattern.permute.xlu2 %v1502_v3  ;;  %1476 = vset.pattern.permute.xlu1 %v1502_v3  ;;  %v650_v4 = vld [vmem:[%s2012_s0 + $0x70] sm:$0xff]  ;;  %v637_v6 = vld [vmem:[%s2012_s0 + $0x8] sm:$0xff]  ;;  %s1650_s26 = sshll.u32 %s2024_s9, 3  ;;  %s1431_s21 = sshll.u32 %s2026_s19, 4  ;;  %vm419_vm0 = vcmask 261120  }
   0xe   : > { %1475 = vset.pattern.permute.xlu0 %v1502_v3  ;;  %690 = vperm.xlu2 %1477, %v640_v0   ;;  %v667_v7 = vld [vmem:[%s2012_s0 + $0xf8] sm:$0xff]  ;;  %v666_v8 = vld [vmem:[%s2012_s0 + $0xf0] sm:$0xff]  ;;  %v664_v10 = vld [vmem:[%s2012_s0 + $0xe0] sm:$0xff]  ;;  %s1656_s29 = scalar_lea.vmem %s2013_s1, %s1650_s26  ;;  %s1752_s15 = scalar_lea.vmem %s2014_s2, %s1431_s21  ;;  %vm1250_vm1 = vcmask 7168  }
   0xf   : > { %680 = vperm.xlu1 %1476, %v638_v1   ;;  %670 = vperm.xlu0 %1475, %v636_v2   ;;  %v651_v9 = vld [vmem:[%s2012_s0 + $0x78] sm:$0xff]  ;;  %v649_v11 = vld [vmem:[%s2012_s0 + $0x68] sm:$0xff]  ;;  %v648_v12 = vld [vmem:[%s2012_s0 + $0x60] sm:$0xff]  ;;  %s1764_s20 = scalar_lea.vmem %s2015_s3, %s1650_s26  ;;  %s1904_s30 = scalar_lea.vmem %s2017_s5, %s1650_s26 }
  0x10   : > { %v647_v13 = vld [vmem:[%s2012_s0 + $0x58] sm:$0xff]  ;;  %v646_v14 = vld [vmem:[%s2012_s0 + $0x50] sm:$0xff]  ;;  %v665_v15 = vld [vmem:[%s2012_s0 + $0xe8] sm:$0xff]  ;;  %s1969_s21 = scalar_lea.vmem %s2018_s6, %s1650_s26 }
  0x11   : > { %v644_v16 = vld [vmem:[%s2012_s0 + $0x40] sm:$0xff]  ;;  %v663_v17 = vld [vmem:[%s2012_s0 + $0xd8] sm:$0xff]  ;;  %v662_v18 = vld [vmem:[%s2012_s0 + $0xd0] sm:$0xff] }
  0x12   : > { %v661_v19 = vld [vmem:[%s2012_s0 + $0xc8] sm:$0xff]  ;;  %v660_v20 = vld [vmem:[%s2012_s0 + $0xc0] sm:$0xff]  ;;  %v658_v22 = vld [vmem:[%s2012_s0 + $0xb0] sm:$0xff] }
  0x13   : > { %v645_v21 = vld [vmem:[%s2012_s0 + $0x48] sm:$0xff]  ;;  %v643_v23 = vld [vmem:[%s2012_s0 + $0x38] sm:$0xff]  ;;  %v642_v24 = vld [vmem:[%s2012_s0 + $0x30] sm:$0xff] }
  0x14   : > { %v656_v25 = vld [vmem:[%s2012_s0 + $0xa0] sm:$0xff]  ;;  %v641_v26 = vld [vmem:[%s2012_s0 + $0x28] sm:$0xff]  ;;  %v659_v27 = vld [vmem:[%s2012_s0 + $0xb8] sm:$0xff] }
  0x15   : > { %v655_v28 = vld [vmem:[%s2012_s0 + $0x98] sm:$0xff]  ;;  %v654_v29 = vld [vmem:[%s2012_s0 + $0x90] sm:$0xff]  ;;  %v657_v30 = vld [vmem:[%s2012_s0 + $0xa8] sm:$0xff] }
  0x16   : > { %740 = vperm.xlu2 %1477, %v650_v4   ;;  %v1058_v31 = vld [vmem:[%s1656_s29] sm:$0xff]  ;;  %v653_v32 = vld [vmem:[%s2012_s0 + $0x88] sm:$0xff]  ;;  %v1061_v34 = vld [vmem:[%s1656_s29 + $0x18] sm:$0xff] }
  0x17   : > { %685 = vperm.xlu1 %1476, %v639_v5   ;;  %675 = vperm.xlu0 %1475, %v637_v6   ;;  %v652_v33 = vld [vmem:[%s2012_s0 + $0x80] sm:$0xff]  ;;  %v1060_v35 = vld [vmem:[%s1656_s29 + $0x10] sm:$0xff]  ;;  %v1059_v36 = vld [vmem:[%s1656_s29 + $0x8] sm:$0xff] }
  0x18   : > { %v1064_v37 = vld [vmem:[%s1656_s29 + $0x30] sm:$0xff]  ;;  %v1063_v38 = vld [vmem:[%s1656_s29 + $0x28] sm:$0xff]  ;;  %v1062_v39 = vld [vmem:[%s1656_s29 + $0x20] sm:$0xff] }
  0x19   : > { %v1067_v41 = vld [vmem:[%s1656_s29 + $0x48] sm:$0xff]  ;;  %v1066_v42 = vld [vmem:[%s1656_s29 + $0x40] sm:$0xff]  ;;  %v1065_v43 = vld [vmem:[%s1656_s29 + $0x38] sm:$0xff] }
  0x1a   : > { %v1070_v44 = vld [vmem:[%s1656_s29 + $0x60] sm:$0xff]  ;;  %v1069_v46 = vld [vmem:[%s1656_s29 + $0x58] sm:$0xff]  ;;  %v1068_v47 = vld [vmem:[%s1656_s29 + $0x50] sm:$0xff] }
  0x1b   : > { %v1073_v50 = vld [vmem:[%s1656_s29 + $0x78] sm:$0xff]  ;;  %v1072_v51 = vld [vmem:[%s1656_s29 + $0x70] sm:$0xff]  ;;  %v1071_v52 = vld [vmem:[%s1656_s29 + $0x68] sm:$0xff] }
  0x1c   : > { %v604_v54 = vld [vmem:[%s2016_s4] sm:$0xff]  ;;  %v605_v55 = vld [vmem:[%s2016_s4 + $0x8] sm:$0xff]  ;;  %v618_v61 = vld [vmem:[%s2016_s4 + $0x70] sm:$0xff] }
  0x1d   : > { %v635_v62 = vld [vmem:[%s2016_s4 + $0xf8] sm:$0xff]  ;;  %v634_v63 = vld [vmem:[%s2016_s4 + $0xf0] sm:$0xff] }
  0x1e   : > { %825 = vperm.xlu2 %1477, %v667_v7   ;;  %v619_v0 = vld [vmem:[%s2016_s4 + $0x78] sm:$0xff] }
  0x1f   : > { %820 = vperm.xlu1 %1476, %v666_v8   ;;  %745 = vperm.xlu0 %1475, %v651_v9  }
  0x26   : > { %810 = vperm.xlu2 %1477, %v664_v10   ;;  %v617_v10 = vld [vmem:[%s2016_s4 + $0x68] sm:$0xff] }
  0x27   : > { %735 = vperm.xlu1 %1476, %v649_v11   ;;  %730 = vperm.xlu0 %1475, %v648_v12   ;;  %v616_v11 = vld [vmem:[%s2016_s4 + $0x60] sm:$0xff] }
  0x2e   : > { %725 = vperm.xlu2 %1477, %v647_v13  }
  0x2f   : > { %720 = vperm.xlu1 %1476, %v646_v14   ;;  %815 = vperm.xlu0 %1475, %v665_v15  }
  0x36   : > { %710 = vperm.xlu2 %1477, %v644_v16  }
  0x37   : > { %805 = vperm.xlu1 %1476, %v663_v17   ;;  %800 = vperm.xlu0 %1475, %v662_v18   ;;  %v632_v18 = vld [vmem:[%s2016_s4 + $0xe0] sm:$0xff] }
  0x3e   : > { %795 = vperm.xlu2 %1477, %v661_v19   ;;  %v615_v19 = vld [vmem:[%s2016_s4 + $0x58] sm:$0xff] }
  0x3f   : > { %790 = vperm.xlu1 %1476, %v660_v20   ;;  %715 = vperm.xlu0 %1475, %v645_v21   ;;  %v614_v20 = vld [vmem:[%s2016_s4 + $0x50] sm:$0xff]  ;;  %v633_v21 = vld [vmem:[%s2016_s4 + $0xe8] sm:$0xff] }
  0x46   : > { %780 = vperm.xlu2 %1477, %v658_v22  }
  0x47   : > { %705 = vperm.xlu1 %1476, %v643_v23   ;;  %700 = vperm.xlu0 %1475, %v642_v24  }
  0x4e   : > { %770 = vperm.xlu2 %1477, %v656_v25  }
  0x4f   : > { %695 = vperm.xlu1 %1476, %v641_v26   ;;  %785 = vperm.xlu0 %1475, %v659_v27  }
  0x56   : > { %765 = vperm.xlu2 %1477, %v655_v28  }
  0x57   : > { %760 = vperm.xlu1 %1476, %v654_v29   ;;  %775 = vperm.xlu0 %1475, %v657_v30  }
  0x5e   : > { %1076 = vperm.xlu2 %1477, %v1058_v31   ;;  %v631_v31 = vld [vmem:[%s2016_s4 + $0xd8] sm:$0xff] }
  0x5f   : > { %755 = vperm.xlu1 %1476, %v653_v32   ;;  %750 = vperm.xlu0 %1475, %v652_v33   ;;  %v630_v32 = vld [vmem:[%s2016_s4 + $0xd0] sm:$0xff] }
  0x66   : > { %1091 = vperm.xlu2 %1477, %v1061_v34  }
  0x67   : > { %1086 = vperm.xlu1 %1476, %v1060_v35   ;;  %1081 = vperm.xlu0 %1475, %v1059_v36  }
  0x68   : > { %v1671_v40 = vpop.permute.xlu2 %690 }
  0x6e   : > { %1106 = vperm.xlu2 %1477, %v1064_v37  }
  0x6f   : > { %1101 = vperm.xlu1 %1476, %v1063_v38   ;;  %1096 = vperm.xlu0 %1475, %v1062_v39   ;;  %v612_v38 = vld [vmem:[%s2016_s4 + $0x40] sm:$0xff] }
  0x70   : > { %v741_v45 = vpop.permute.xlu2 %740 }
  0x71   : > { %v842_v4 = vmul.f32 %v741_v45, %v618_v61 }
  0x76   : > { %1121 = vperm.xlu2 %1477, %v1067_v41   ;;  %v629_v41 = vld [vmem:[%s2016_s4 + $0xc8] sm:$0xff] }
  0x77   : > { %1116 = vperm.xlu1 %1476, %v1066_v42   ;;  %1111 = vperm.xlu0 %1475, %v1065_v43   ;;  %v628_v42 = vld [vmem:[%s2016_s4 + $0xc0] sm:$0xff]  ;;  %v613_v43 = vld [vmem:[%s2016_s4 + $0x48] sm:$0xff] }
  0x78   : > { %v826_v53 = vpop.permute.xlu2 %825 }
  0x79   : > { %v859_v5 = vmul.f32 %v826_v53, %v635_v62  ;;  %v611_v53 = vld [vmem:[%s2016_s4 + $0x38] sm:$0xff] }
  0x7e   : > { %1136 = vperm.xlu2 %1477, %v1070_v44  }
  0x7f   : > { %1131 = vperm.xlu1 %1476, %v1069_v46   ;;  %1126 = vperm.xlu0 %1475, %v1068_v47  }
  0x80   : > { %v811_v1 = vpop.permute.xlu2 %810 }
  0x81   : > { %v1679_v48 = vpop.permute.xlu1 %680  ;;  %v671_v49 = vpop.permute.xlu0 %670  ;;  %v856_v24 = vmul.f32 %v811_v1, %v632_v18  ;;  %v1767_v1 = vld [vmem:[%s1752_s15 + $0x20] sm:$0xff] }
  0x82   : > { %v828_v58 = vmul.f32 %v671_v49, %v604_v54  ;;  %v610_v54 = vld [vmem:[%s2016_s4 + $0x30] sm:$0xff] }
  0x86   : > { %1151 = vperm.xlu2 %1477, %v1073_v50  }
  0x87   : > { %1146 = vperm.xlu1 %1476, %v1072_v51   ;;  %1141 = vperm.xlu0 %1475, %v1071_v52  }
  0x88   : > { %v726_v14 = vpop.permute.xlu2 %725 }
  0x89   : > { %v1690_v56 = vpop.permute.xlu1 %685  ;;  %v676_v57 = vpop.permute.xlu0 %675  ;;  %v839_v25 = vmul.f32 %v726_v14, %v615_v19  ;;  %v1793_v19 = vld [vmem:[%s1764_s20 + $0x40] sm:$0xff] }
  0x8a   : > { %v829_v59 = vmul.f32 %v676_v57, %v605_v55 }
  0x8c   : > { %v1692_v60 = vpack.c.bf16 %v829_v59, %v828_v58 }
  0x90   : > { %v711_v28 = vpop.permute.xlu2 %710 }
  0x91   : > { %v821_v2 = vpop.permute.xlu1 %820  ;;  %v746_v3 = vpop.permute.xlu0 %745  ;;  %v836_v46 = vmul.f32 %v711_v28, %v612_v38 }
  0x92   : > { %v858_v6 = vmul.f32 %v821_v2, %v634_v63  ;;  %v843_v7 = vmul.f32 %v746_v3, %v619_v0  ;;  %v1755_v63 = vld [vmem:[%s1752_s15] sm:$0xff]  ;;  %v626_v2 = vld [vmem:[%s2016_s4 + $0xb0] sm:$0xff]  ;;  %v609_v3 = vld [vmem:[%s2016_s4 + $0x28] sm:$0xff] }
  0x93   : > { %v608_v0 = vld [vmem:[%s2016_s4 + $0x20] sm:$0xff] }
  0x94   : > { %v867_v8 = vpack.c.bf16 %v843_v7, %v842_v4  ;;  %v875_v9 = vpack.c.bf16 %v859_v5, %v858_v6  ;;  %v627_v4 = vld [vmem:[%s2016_s4 + $0xb8] sm:$0xff]  ;;  %v444_v5 = vunpack.c.0.s8 %v1755_v63  ;;  %v446_v6 = vunpack.c.1.s8 %v1755_v63 }
  0x95   : > { %v607_v7 = vld [vmem:[%s2016_s4 + $0x18] sm:$0xff]  ;;  %v832_v14 = vmul.f32 %v1671_v40, %v608_v0 }
  0x96   : > { %892 = vmatpush.bf16.msra.mxu0 %v867_v8  ;;  %1433 = vmatpush.bf16.msra.mxu2 %v867_v8 }
  0x97   : > { %941 = vmatpush.bf16.msra.mxu1 %v875_v9  ;;  %1441 = vmatpush.bf16.msra.mxu3 %v875_v9 }
  0x98   : > { %v796_v39 = vpop.permute.xlu2 %795 }
  0x99   : > { %v736_v12 = vpop.permute.xlu1 %735  ;;  %v731_v13 = vpop.permute.xlu0 %730  ;;  %v853_v47 = vmul.f32 %v796_v39, %v629_v41 }
  0x9a   : > { %v841_v15 = vmul.f32 %v736_v12, %v617_v10  ;;  %v840_v16 = vmul.f32 %v731_v13, %v616_v11  ;;  %v1784_v10 = vld [vmem:[%s1764_s20] sm:$0xff]  ;;  %v1787_v11 = vld [vmem:[%s1764_s20 + $0x8] sm:$0xff]  ;;  %v460_v12 = vunpack.c.0.s8 %v1767_v1  ;;  %v462_v13 = vunpack.c.1.s8 %v1767_v1 }
  0x9c   : > { %v866_v17 = vpack.c.bf16 %v841_v15, %v840_v16  ;;  %v492_v28 = vcvt.s32.f32 %v460_v12 }
  0x9e   : > { %893 = vmatpush.bf16.msra.mxu0 %v866_v17  ;;  %1434 = vmatpush.bf16.msra.mxu2 %v866_v17 }
  0xa0   : > { %v781_v55 = vpop.permute.xlu2 %780 }
  0xa1   : > { %v721_v22 = vpop.permute.xlu1 %720  ;;  %v816_v23 = vpop.permute.xlu0 %815  ;;  %v850_v15 = vmul.f32 %v781_v55, %v626_v2 }
  0xa2   : > { %v838_v26 = vmul.f32 %v721_v22, %v614_v20  ;;  %v857_v27 = vmul.f32 %v816_v23, %v633_v21  ;;  %v1796_v20 = vld [vmem:[%s1764_s20 + $0x48] sm:$0xff]  ;;  %v606_v21 = vld [vmem:[%s2016_s4 + $0x10] sm:$0xff]  ;;  %v831_v22 = vmul.f32 %v1690_v56, %v607_v7  ;;  %v476_v23 = vcvt.s32.f32 %v444_v5  ;;  %v624_v56 = vld [vmem:[%s2016_s4 + $0xa0] sm:$0xff] }
  0xa3   : > { %v620_v7 = vld [vmem:[%s2016_s4 + $0x80] sm:$0xff] }
  0xa4   : > { %v865_v29 = vpack.c.bf16 %v839_v25, %v838_v26  ;;  %v874_v30 = vpack.c.bf16 %v857_v27, %v856_v24  ;;  %v478_v24 = vcvt.s32.f32 %v446_v6  ;;  %v524_v26 = vunpack.c.l.bf16 %v1784_v10  ;;  %v621_v6 = vld [vmem:[%s2016_s4 + $0x88] sm:$0xff] }
  0xa5   : > { %v526_v27 = vunpack.c.l.bf16 %v1787_v11 }
  0xa6   : > { %894 = vmatpush.bf16.msra.mxu0 %v865_v29  ;;  %1435 = vmatpush.bf16.msra.mxu2 %v865_v29  ;;  %v494_v29 = vcvt.s32.f32 %v462_v13 }
  0xa7   : > { %942 = vmatpush.bf16.msra.mxu1 %v874_v30  ;;  %1442 = vmatpush.bf16.msra.mxu3 %v874_v30  ;;  %v540_v30 = vunpack.c.l.bf16 %v1793_v19  ;;  %v558_v38 = vmul.f32 %v526_v27, %v478_v24 }
  0xa8   : > { %v771_v16 = vpop.permute.xlu2 %770 }
  0xa9   : > { %v806_v33 = vpop.permute.xlu1 %805  ;;  %v801_v34 = vpop.permute.xlu0 %800 }
  0xaa   : > { %v855_v35 = vmul.f32 %v806_v33, %v631_v31  ;;  %v854_v36 = vmul.f32 %v801_v34, %v630_v32  ;;  %v542_v31 = vunpack.c.l.bf16 %v1796_v20  ;;  %v1807_v32 = vld [vmem:[%s1752_s15 + $0x8] sm:$0xff]  ;;  %v830_v33 = vmul.f32 %v1679_v48, %v606_v21 }
  0xab   : > { %v625_v34 = vld [vmem:[%s2016_s4 + $0xa8] sm:$0xff]  ;;  %v445_v39 = vunpack.c.0.s8 %v1807_v32 }
  0xac   : > { %v873_v37 = vpack.c.bf16 %v855_v35, %v854_v36  ;;  %v1817_v35 = vld [vmem:[%s1752_s15 + $0x28] sm:$0xff]  ;;  %v861_v36 = vpack.c.bf16 %v831_v22, %v830_v33  ;;  %v518_v22 = vld [vmem:[%s1764_s20 + $0x50] sm:$0xff] }
  0xad   : > { %v477_v55 = vcvt.s32.f32 %v445_v39  ;;  %v465_v39 = vunpack.c.2.s8 %v1817_v35 }
  0xae   : > { %943 = vmatpush.bf16.msra.mxu1 %v873_v37  ;;  %1443 = vmatpush.bf16.msra.mxu3 %v873_v37  ;;  %v556_v37 = vmul.f32 %v524_v26, %v476_v23  ;;  %v519_v23 = vld [vmem:[%s1764_s20 + $0x58] sm:$0xff] }
  0xb1   : > { %v791_v44 = vpop.permute.xlu1 %790  ;;  %v716_v45 = vpop.permute.xlu0 %715 }
  0xb2   : > { %v852_v49 = vmul.f32 %v791_v44, %v628_v42  ;;  %v837_v50 = vmul.f32 %v716_v45, %v613_v43  ;;  %v572_v42 = vmul.f32 %v540_v30, %v492_v28  ;;  %v574_v43 = vmul.f32 %v542_v31, %v494_v29 }
  0xb3   : > { %v447_v44 = vunpack.c.1.s8 %v1807_v32  ;;  %v848_v45 = vmul.f32 %v771_v16, %v624_v56  ;;  %v464_v16 = vunpack.c.2.s8 %v1767_v1  ;;  %v544_v29 = vunpack.c.l.bf16 %v518_v22 }
  0xb4   : > { %v864_v51 = vpack.c.bf16 %v837_v50, %v836_v46  ;;  %v872_v52 = vpack.c.bf16 %v853_v47, %v852_v49  ;;  %v622_v46 = vld [vmem:[%s2016_s4 + $0x90] sm:$0xff]  ;;  %v461_v49 = vunpack.c.0.s8 %v1817_v35  ;;  %v463_v50 = vunpack.c.1.s8 %v1817_v35 }
  0xb5   : > { %v496_v27 = vcvt.s32.f32 %v464_v16  ;;  %v546_v30 = vunpack.c.l.bf16 %v519_v23 }
  0xb6   : > { %895 = vmatpush.bf16.msra.mxu0 %v864_v51  ;;  %1436 = vmatpush.bf16.msra.mxu2 %v864_v51  ;;  %v766_v51 = vpop.permute.xlu2 %765  ;;  %v493_v0 = vcvt.s32.f32 %v461_v49  ;;  %v495_v2 = vcvt.s32.f32 %v463_v50  ;;  %v497_v49 = vcvt.s32.f32 %v465_v39 }
  0xb7   : > { %944 = vmatpush.bf16.msra.mxu1 %v872_v52  ;;  %1444 = vmatpush.bf16.msra.mxu3 %v872_v52  ;;  %v623_v52 = vld [vmem:[%s2016_s4 + $0x98] sm:$0xff] }
  0xb8   : > { %v847_v5 = vmul.f32 %v766_v51, %v623_v52  ;;  %v547_v51 = vunpack.c.h.bf16 %v519_v23  ;;  %v1857_v52 = vld [vmem:[%s1752_s15 + $0x30] sm:$0xff] }
  0xb9   : > { %v706_v57 = vpop.permute.xlu1 %705  ;;  %v701_v58 = vpop.permute.xlu0 %700 }
  0xba   : > { %v835_v59 = vmul.f32 %v706_v57, %v611_v53  ;;  %v834_v61 = vmul.f32 %v701_v58, %v610_v54  ;;  %v588_v54 = vpack.c.bf16 %v558_v38, %v556_v37  ;;  %v525_v57 = vunpack.c.h.bf16 %v1784_v10  ;;  %v510_v10 = vld [vmem:[%s1764_s20 + $0x10] sm:$0xff] }
  0xbb   : > { %v449_v37 = vunpack.c.2.s8 %v1807_v32  ;;  %v451_v38 = vunpack.c.3.s8 %v1807_v32  ;;  %v545_v32 = vunpack.c.h.bf16 %v518_v22 }
  0xbc   : > { %v863_v62 = vpack.c.bf16 %v835_v59, %v834_v61  ;;  %v596_v59 = vpack.c.bf16 %v574_v43, %v572_v42  ;;  %v479_v61 = vcvt.s32.f32 %v447_v44  ;;  %v529_v42 = vunpack.c.h.bf16 %v510_v10 }
  0xbd   : > { %v481_v44 = vcvt.s32.f32 %v449_v37 }
  0xbe   : > { %896 = vmatpush.bf16.msra.mxu0 %v863_v62  ;;  %1437 = vmatpush.bf16.msra.mxu2 %v863_v62  ;;  %v527_v62 = vunpack.c.h.bf16 %v1787_v11 }
  0xc1   : > { %v696_v8 = vpop.permute.xlu1 %695  ;;  %v786_v9 = vpop.permute.xlu0 %785 }
  0xc2   : > { %v833_v17 = vmul.f32 %v696_v8, %v609_v3  ;;  %v851_v18 = vmul.f32 %v786_v9, %v627_v4  ;;  %v541_v3 = vunpack.c.h.bf16 %v1793_v19  ;;  %v543_v4 = vunpack.c.h.bf16 %v1796_v20 }
  0xc3   : > { %v557_v8 = vmul.f32 %v525_v57, %v477_v55  ;;  %v450_v9 = vunpack.c.3.s8 %v1755_v63  ;;  %v513_v55 = vld [vmem:[%s1764_s20 + $0x28] sm:$0xff]  ;;  %v468_v57 = vunpack.c.0.s8 %v1857_v52 }
  0xc4   : > { %v862_v25 = vpack.c.bf16 %v833_v17, %v832_v14  ;;  %v871_v40 = vpack.c.bf16 %v851_v18, %v850_v15  ;;  %v559_v14 = vmul.f32 %v527_v62, %v479_v61  ;;  %v511_v15 = vld [vmem:[%s1764_s20 + $0x18] sm:$0xff]  ;;  %v466_v17 = vunpack.c.3.s8 %v1767_v1 }
  0xc5   : > { %v573_v20 = vmul.f32 %v541_v3, %v493_v0  ;;  %v575_v21 = vmul.f32 %v543_v4, %v495_v2  ;;  %v530_v26 = vunpack.c.l.bf16 %v511_v15  ;;  %v577_v62 = vmul.f32 %v545_v32, %v497_v49  ;;  %v520_v2 = vld [vmem:[%s1764_s20 + $0x60] sm:$0xff]  ;;  %v521_v3 = vld [vmem:[%s1764_s20 + $0x68] sm:$0xff] }
  0xc6   : > { %897 = vmatpush.bf16.msra.mxu0 %v862_v25  ;;  %1438 = vmatpush.bf16.msra.mxu2 %v862_v25  ;;  %v498_v28 = vcvt.s32.f32 %v466_v17  ;;  %v589_v31 = vpack.c.bf16 %v559_v14, %v557_v8  ;;  %v500_v8 = vcvt.s32.f32 %v468_v57  ;;  %v443_v14 = vld [vmem:[%s1752_s15 + $0x38] sm:$0xff] }
  0xc7   : > { %945 = vmatpush.bf16.msra.mxu1 %v871_v40  ;;  %1445 = vmatpush.bf16.msra.mxu3 %v871_v40  ;;  %v482_v40 = vcvt.s32.f32 %v450_v9  ;;  %v597_v33 = vpack.c.bf16 %v575_v21, %v573_v20  ;;  %v548_v9 = vunpack.c.l.bf16 %v520_v2  ;;  %v469_v21 = vunpack.c.0.s8 %v443_v14 }
  0xc8   : > { %v471_v22 = vunpack.c.1.s8 %v443_v14 }
  0xc9   : > { %v761_v48 = vpop.permute.xlu1 %760  ;;  %v776_v41 = vpop.permute.xlu0 %775  ;;  %v562_v56 = vmul.f32 %v530_v26, %v482_v40  ;;  %v580_v17 = vmul.f32 %v548_v9, %v500_v8  ;;  %v535_v26 = vunpack.c.h.bf16 %v513_v55 }
  0xca   : > { %v849_v47 = vmul.f32 %v776_v41, %v625_v34  ;;  %898 = vmatpush.bf16.msra.mxu0 %v861_v36  ;;  %1439 = vmatpush.bf16.msra.mxu2 %v861_v36  ;;  %v846_v58 = vmul.f32 %v761_v48, %v622_v46  ;;  %v576_v34 = vmul.f32 %v544_v29, %v496_v27  ;;  %v467_v48 = vunpack.c.3.s8 %v1817_v35 }
  0xcb   : > { %v578_v36 = vmul.f32 %v546_v30, %v498_v28  ;;  %v531_v46 = vunpack.c.h.bf16 %v511_v15  ;;  %v501_v27 = vcvt.s32.f32 %v469_v21  ;;  %v503_v28 = vcvt.s32.f32 %v471_v22 }
  0xcc   : > { %v870_v53 = vpack.c.bf16 %v849_v47, %v848_v45  ;;  %v869_v13 = vpack.c.bf16 %v847_v5, %v846_v58  ;;  %v483_v45 = vcvt.s32.f32 %v451_v38  ;;  %v1854_v47 = vld [vmem:[%s1752_s15 + $0x10] sm:$0xff]  ;;  %v499_v50 = vcvt.s32.f32 %v467_v48 }
  0xcd   : > { %v598_v43 = vpack.c.bf16 %v578_v36, %v576_v34  ;;  %v452_v35 = vunpack.c.0.s8 %v1854_v47  ;;  %v470_v58 = vunpack.c.1.s8 %v1857_v52  ;;  %v549_v29 = vunpack.c.h.bf16 %v520_v2 }
  0xce   : > { %899 = vmatpush.bf16.msra.mxu0 %v1692_v60  ;;  %1440 = vmatpush.bf16.msra.mxu2 %v1692_v60  ;;  %v448_v60 = vunpack.c.2.s8 %v1755_v63  ;;  %v528_v63 = vunpack.c.l.bf16 %v510_v10  ;;  %v563_v61 = vmul.f32 %v531_v46, %v483_v45  ;;  %v579_v0 = vmul.f32 %v547_v51, %v499_v50 }
  0xcf   : > { %946 = vmatpush.bf16.msra.mxu1 %v870_v53  ;;  %1446 = vmatpush.bf16.msra.mxu3 %v870_v53  ;;  %v454_v53 = vunpack.c.1.s8 %v1854_v47  ;;  %v484_v4 = vcvt.s32.f32 %v452_v35  ;;  %v550_v10 = vunpack.c.l.bf16 %v521_v3  ;;  %v551_v30 = vunpack.c.h.bf16 %v521_v3 }
  0xd0   : > { %v480_v25 = vcvt.s32.f32 %v448_v60  ;;  %v502_v60 = vcvt.s32.f32 %v470_v58  ;;  %v472_v34 = vunpack.c.2.s8 %v1857_v52  ;;  %v474_v36 = vunpack.c.3.s8 %v1857_v52 }
  0xd1   : > { %v756_v11 = vpop.permute.xlu1 %755  ;;  %v751_v12 = vpop.permute.xlu0 %750  ;;  %900 = vmatmul.bf16.vlgmr.msra.gmra.mxu0 %v588_v54  ;;  %920 = vmatmul.bf16.vlgmr.msra.gmra.mxu2 %v596_v59  ;;  %v512_v54 = vld [vmem:[%s1764_s20 + $0x20] sm:$0xff]  ;;  %v561_v59 = vmul.f32 %v529_v42, %v481_v44  ;;  %v486_v5 = vcvt.s32.f32 %v454_v53  ;;  %v581_v39 = vmul.f32 %v549_v29, %v501_v27  ;;  %v583_v48 = vmul.f32 %v551_v30, %v503_v28  ;;  %v523_v42 = vld [vmem:[%s1764_s20 + $0x78] sm:$0xff] }
  0xd2   : > { %v845_v18 = vmul.f32 %v756_v11, %v621_v6  ;;  %v844_v19 = vmul.f32 %v751_v12, %v620_v7  ;;  %v560_v1 = vmul.f32 %v528_v63, %v480_v25  ;;  %v532_v6 = vunpack.c.l.bf16 %v512_v54 }
  0xd3   : > { %947 = vmatpush.bf16.msra.mxu1 %v869_v13  ;;  %1447 = vmatpush.bf16.msra.mxu3 %v869_v13  ;;  %v534_v7 = vunpack.c.l.bf16 %v513_v55  ;;  %v591_v11 = vpack.c.bf16 %v563_v61, %v561_v59  ;;  %v599_v12 = vpack.c.bf16 %v579_v0, %v577_v62  ;;  %v439_v13 = vld [vmem:[%s1752_s15 + $0x18] sm:$0xff]  ;;  %v533_v63 = vunpack.c.h.bf16 %v512_v54 }
  0xd4   : > { %v868_v24 = vpack.c.bf16 %v845_v18, %v844_v19  ;;  %v590_v41 = vpack.c.bf16 %v562_v56, %v560_v1  ;;  %v564_v15 = vmul.f32 %v532_v6, %v484_v4  ;;  %v582_v18 = vmul.f32 %v550_v10, %v502_v60  ;;  %v514_v1 = vld [vmem:[%s1764_s20 + $0x30] sm:$0xff]  ;;  %v515_v56 = vld [vmem:[%s1764_s20 + $0x38] sm:$0xff] }
  0xd5   : > { %v566_v16 = vmul.f32 %v534_v7, %v486_v5  ;;  %v453_v19 = vunpack.c.0.s8 %v439_v13  ;;  %v455_v20 = vunpack.c.1.s8 %v439_v13  ;;  %v536_v45 = vunpack.c.l.bf16 %v514_v1 }
  0xd6   : > { %v538_v46 = vunpack.c.l.bf16 %v515_v56  ;;  %v504_v49 = vcvt.s32.f32 %v472_v34  ;;  %v554_v32 = vunpack.c.l.bf16 %v523_v42  ;;  %v601_v35 = vpack.c.bf16 %v583_v48, %v581_v39 }
  0xd7   : > { %948 = vmatpush.bf16.msra.mxu1 %v868_v24  ;;  %1448 = vmatpush.bf16.msra.mxu3 %v868_v24  ;;  %v592_v23 = vpack.c.bf16 %v566_v16, %v564_v15  ;;  %v600_v24 = vpack.c.bf16 %v582_v18, %v580_v17  ;;  %v485_v25 = vcvt.s32.f32 %v453_v19  ;;  %v487_v40 = vcvt.s32.f32 %v455_v20  ;;  %v1077_v17 = vpop.permute.xlu2 %1076 }
  0xd8   : > { %v457_v57 = vunpack.c.2.s8 %v439_v13  ;;  %v459_v58 = vunpack.c.3.s8 %v439_v13  ;;  %v473_v59 = vunpack.c.2.s8 %v443_v14  ;;  %v475_v61 = vunpack.c.3.s8 %v443_v14 }
  0xd9   : > { %v565_v37 = vmul.f32 %v533_v63, %v485_v25  ;;  %v567_v38 = vmul.f32 %v535_v26, %v487_v40  ;;  %v537_v0 = vunpack.c.h.bf16 %v514_v1  ;;  %v539_v5 = vunpack.c.h.bf16 %v515_v56  ;;  %v1893_v19 = vpop.permute.xlu1 %1086 }
  0xda   : > { %949 = vmatmul.bf16.vlgmr.msra.gmra.mxu1 %v589_v31  ;;  %969 = vmatmul.bf16.vlgmr.msra.gmra.mxu3 %v597_v33  ;;  %v456_v31 = vunpack.c.2.s8 %v1854_v47  ;;  %v458_v33 = vunpack.c.3.s8 %v1854_v47  ;;  %v506_v47 = vcvt.s32.f32 %v474_v36  ;;  %v489_v3 = vcvt.s32.f32 %v457_v57  ;;  %v1026_v36 = vld [vmem:[%s1904_s30] sm:$0xff] }
  0xdb   : > { %v593_v51 = vpack.c.bf16 %v567_v38, %v565_v37  ;;  %v491_v4 = vcvt.s32.f32 %v459_v58  ;;  %v505_v6 = vcvt.s32.f32 %v473_v59  ;;  %v507_v7 = vcvt.s32.f32 %v475_v61  ;;  %v1027_v61 = vld [vmem:[%s1904_s30 + $0x8] sm:$0xff] }
  0xdc   : > { %v490_v44 = vcvt.s32.f32 %v458_v33  ;;  %v586_v52 = vmul.f32 %v554_v32, %v506_v47  ;;  %v555_v60 = vunpack.c.h.bf16 %v523_v42  ;;  %v569_v9 = vmul.f32 %v537_v0, %v489_v3 }
  0xdd   : > { %v571_v10 = vmul.f32 %v539_v5, %v491_v4  ;;  %v1503_v14 = vmov 0.0  }
  0xde   : > { %v570_v54 = vmul.f32 %v538_v46, %v490_v44  ;;  %420 = vst.msk [vmem:[#allocation2] sm:$0xff] %vm419_vm0, %v1503_v14 }
  0xdf   : > { %v595_v13 = vpack.c.bf16 %v571_v10, %v569_v9  ;;  %421 = vst.msk [vmem:[#allocation2 + $0x8] sm:$0xff] %vm419_vm0, %v1503_v14  ;;  %v1895_v25 = vpop.permute.xlu2 %1091 }
  0xe0   : > { %422 = vst.msk [vmem:[#allocation2 + $0x10] sm:$0xff] %vm419_vm0, %v1503_v14 }
  0xe1   : > { %905 = vmatmul.bf16.gmra.mxu0 %v590_v41  ;;  %925 = vmatmul.bf16.gmra.mxu2 %v598_v43  ;;  %v522_v41 = vld [vmem:[%s1764_s20 + $0x70] sm:$0xff]  ;;  %v488_v43 = vcvt.s32.f32 %v456_v31  ;;  %423 = vst.msk [vmem:[#allocation2 + $0x18] sm:$0xff] %vm419_vm0, %v1503_v14  ;;  %v1898_v30 = vpop.permute.xlu1 %1101 }
  0xe2   : > { %v552_v50 = vunpack.c.l.bf16 %v522_v41  ;;  %v553_v8 = vunpack.c.h.bf16 %v522_v41  ;;  %424 = vst.msk [vmem:[#allocation2 + $0x20] sm:$0xff] %vm419_vm0, %v1503_v14 }
  0xe3   : > { %v568_v53 = vmul.f32 %v536_v45, %v488_v43  ;;  %425 = vst.msk [vmem:[#allocation2 + $0x28] sm:$0xff] %vm419_vm0, %v1503_v14 }
  0xe4   : > { %v584_v55 = vmul.f32 %v552_v50, %v504_v49  ;;  %426 = vst.msk [vmem:[#allocation2 + $0x30] sm:$0xff] %vm419_vm0, %v1503_v14 }
  0xe5   : > { %v594_v62 = vpack.c.bf16 %v570_v54, %v568_v53  ;;  %427 = vst.msk [vmem:[#allocation2 + $0x38] sm:$0xff] %vm419_vm0, %v1503_v14  ;;  %v876_v21 = vld [vmem:[#allocation2] sm:$0xff] }
  0xe6   : > { %v602_v2 = vpack.c.bf16 %v586_v52, %v584_v55  ;;  %428 = vst.msk [vmem:[#allocation2 + $0x40] sm:$0xff] %vm419_vm0, %v1503_v14  ;;  %v877_v31 = vld [vmem:[#allocation2 + $0x8] sm:$0xff]  ;;  %v1034_v53 = vld [vmem:[%s1904_s30 + $0x40] sm:$0xff] }
  0xe7   : > { %429 = vst.msk [vmem:[#allocation2 + $0x48] sm:$0xff] %vm419_vm0, %v1503_v14  ;;  %v1911_v43 = vpop.permute.xlu2 %1106  ;;  %v878_v49 = vld [vmem:[#allocation2 + $0x10] sm:$0xff] }
  0xe8   : > { %430 = vst.msk [vmem:[#allocation2 + $0x50] sm:$0xff] %vm419_vm0, %v1503_v14 }
  0xe9   : > { %431 = vst.msk [vmem:[#allocation2 + $0x58] sm:$0xff] %vm419_vm0, %v1503_v14 }
  0xea   : > { %954 = vmatmul.bf16.gmra.mxu1 %v591_v11  ;;  %974 = vmatmul.bf16.gmra.mxu3 %v599_v12  ;;  %v585_v11 = vmul.f32 %v553_v8, %v505_v6  ;;  %v587_v12 = vmul.f32 %v555_v60, %v507_v7  ;;  %432 = vst.msk [vmem:[#allocation2 + $0x60] sm:$0xff] %vm419_vm0, %v1503_v14  ;;  %v879_v7 = vld [vmem:[#allocation2 + $0x18] sm:$0xff] }
  0xeb   : > { %433 = vst.msk [vmem:[#allocation2 + $0x68] sm:$0xff] %vm419_vm0, %v1503_v14 }
  0xec   : > { %v603_v15 = vpack.c.bf16 %v587_v12, %v585_v11  ;;  %434 = vst.msk [vmem:[#allocation2 + $0x70] sm:$0xff] %vm419_vm0, %v1503_v14 }
  0xed   : > { %435 = vst.msk [vmem:[#allocation2 + $0x78] sm:$0xff] %vm419_vm0, %v1503_v14  ;;  %v884_v26 = vld [vmem:[#allocation2 + $0x40] sm:$0xff] }
  0xee   : > { %v885_v41 = vld [vmem:[#allocation2 + $0x48] sm:$0xff] }
  0xef   : > { %v886_v0 = vld [vmem:[#allocation2 + $0x50] sm:$0xff]  ;;  %v1122_v12 = vpop.permute.xlu2 %1121 }
  0xf1   : > { %910 = vmatmul.bf16.gmra.mxu0 %v592_v23  ;;  %930 = vmatmul.bf16.gmra.mxu2 %v600_v24  ;;  %v1082_v24 = vpop.permute.xlu0 %1081 }
  0xf9   : > { %v1909_v48 = vpop.permute.xlu0 %1096 }
  0xfa   : > { %959 = vmatmul.bf16.gmra.mxu1 %v593_v51  ;;  %979 = vmatmul.bf16.gmra.mxu3 %v601_v35  ;;  %v1117_v35 = vpop.permute.xlu1 %1116 }
 0x101   : > { %915 = vmatmul.bf16.gmra.mxu0 %v594_v62  ;;  %935 = vmatmul.bf16.gmra.mxu2 %v602_v2  ;;  %v1918_v6 = vpop.permute.xlu0 %1111 }
 0x10a   : > { %964 = vmatmul.bf16.gmra.mxu1 %v595_v13  ;;  %984 = vmatmul.bf16.gmra.mxu3 %v603_v15  ;;  %v1035_v15 = vld [vmem:[%s1904_s30 + $0x48] sm:$0xff] }
 0x14e   : > { %v901_v16 = vpop.f32.mrf.mxu0 }
 0x154   : > { %v921_v18 = vpop.f32.mrf.mxu2 }
 0x156   : > { %v903_v20 = vpop.f32.mrf.mxu0 }
 0x157   : > { %v950_v22 = vpop.f32.mrf.mxu1 }
 0x158   : > { %v951_v23 = vadd.f32 %v950_v22, %v901_v16 }
 0x15a   : > { %v990_v63 = vadd.f32 %v951_v23, %v876_v21  ;;  %v887_v23 = vld [vmem:[#allocation2 + $0x58] sm:$0xff] }
 0x15c   : > { %1007 = vst.msk [vmem:[#allocation2] sm:$0xff] %vm419_vm0, %v990_v63  ;;  %v923_v40 = vpop.f32.mrf.mxu2 }
 0x15d   : > { %v970_v27 = vpop.f32.mrf.mxu3 }
 0x15e   : > { %v971_v28 = vadd.f32 %v970_v27, %v921_v18  ;;  %v906_v29 = vpop.f32.mrf.mxu0 }
 0x15f   : > { %v952_v33 = vpop.f32.mrf.mxu1 }
 0x160   : > { %v998_v1 = vadd.f32 %v971_v28, %v884_v26  ;;  %v953_v56 = vadd.f32 %v952_v33, %v903_v20  ;;  %v880_v28 = vld [vmem:[#allocation2 + $0x20] sm:$0xff] }
 0x162   : > { %1015 = vst.msk [vmem:[#allocation2 + $0x40] sm:$0xff] %vm419_vm0, %v998_v1  ;;  %v991_v34 = vadd.f32 %v953_v56, %v877_v31 }
 0x163   : > { %v1042_v37 = vld [vmem:[#allocation2] sm:$0xff] }
 0x164   : > { %1008 = vst.msk [vmem:[#allocation2 + $0x8] sm:$0xff] %vm419_vm0, %v991_v34  ;;  %v926_v38 = vpop.f32.mrf.mxu2  ;;  %v1154_v39 = vmul.f32 %v1077_v17, %v1042_v37 }
 0x165   : > { %v972_v42 = vpop.f32.mrf.mxu3 }
 0x166   : > { %v973_v44 = vadd.f32 %v972_v42, %v923_v40  ;;  %v1170_v45 = vsub.f32 %v1026_v36, %v1154_v39  ;;  %v908_v46 = vpop.f32.mrf.mxu0  ;;  %v1127_v36 = vpop.permute.xlu0 %1126 }
 0x167   : > { %v955_v47 = vpop.f32.mrf.mxu1 }
 0x168   : > { %v999_v50 = vadd.f32 %v973_v44, %v885_v41  ;;  %v956_v32 = vadd.f32 %v955_v47, %v906_v29  ;;  %v1186_v51 = vand.u32 2147483647, %v1170_v45  ;;  %v888_v47 = vld [vmem:[#allocation2 + $0x60] sm:$0xff] }
 0x169   : > { %v1050_v54 = vld [vmem:[#allocation2 + $0x40] sm:$0xff] }
 0x16a   : > { %1016 = vst.msk [vmem:[#allocation2 + $0x48] sm:$0xff] %vm419_vm0, %v999_v50  ;;  %v992_v55 = vadd.f32 %v956_v32, %v878_v49  ;;  %v1202_v52 = vsel %vm419_vm0, %v1186_v51, 0.0  ;;  %v1162_v57 = vmul.f32 %v1117_v35, %v1050_v54  ;;  %v881_v35 = vld [vmem:[#allocation2 + $0x28] sm:$0xff] }
 0x16b   : > { %1203 = vadd.xlane.f32.xlu0 %v1202_v52  ;;  %v1043_v58 = vld [vmem:[#allocation2 + $0x8] sm:$0xff] }
 0x16c   : > { %1009 = vst.msk [vmem:[#allocation2 + $0x10] sm:$0xff] %vm419_vm0, %v992_v55  ;;  %v1178_v59 = vsub.f32 %v1034_v53, %v1162_v57  ;;  %v1155_v62 = vmul.f32 %v1082_v24, %v1043_v58  ;;  %v928_v3 = vpop.f32.mrf.mxu2  ;;  %v1028_v24 = vld [vmem:[%s1904_s30 + $0x10] sm:$0xff] }
 0x16d   : > { %v975_v2 = vpop.f32.mrf.mxu3 }
 0x16e   : > { %v976_v4 = vadd.f32 %v975_v2, %v926_v38  ;;  %v1194_v5 = vand.u32 2147483647, %v1178_v59  ;;  %v1171_v60 = vsub.f32 %v1027_v61, %v1155_v62  ;;  %v911_v13 = vpop.f32.mrf.mxu0  ;;  %v1132_v59 = vpop.permute.xlu1 %1131 }
 0x16f   : > { %v957_v8 = vpop.f32.mrf.mxu1 }
 0x170   : > { %v1000_v9 = vadd.f32 %v976_v4, %v886_v0  ;;  %v958_v10 = vadd.f32 %v957_v8, %v908_v46  ;;  %v1226_v11 = vsel %vm419_vm0, %v1194_v5, 0.0  ;;  %v1187_v18 = vand.u32 2147483647, %v1171_v60  ;;  %v1029_v46 = vld [vmem:[%s1904_s30 + $0x18] sm:$0xff]  ;;  %v1030_v4 = vld [vmem:[%s1904_s30 + $0x20] sm:$0xff] }
 0x171   : > { %1227 = vadd.xlane.f32.xlu1 %v1226_v11  ;;  %v1051_v14 = vld [vmem:[#allocation2 + $0x48] sm:$0xff] }
 0x172   : > { %1017 = vst.msk [vmem:[#allocation2 + $0x50] sm:$0xff] %vm419_vm0, %v1000_v9  ;;  %v993_v16 = vadd.f32 %v958_v10, %v879_v7  ;;  %v1163_v17 = vmul.f32 %v1122_v12, %v1051_v14  ;;  %v1205_v31 = vsel %vm419_vm0, %v1187_v18, 0.0  ;;  %v889_v9 = vld [vmem:[#allocation2 + $0x68] sm:$0xff] }
 0x173   : > { %v1044_v20 = vld [vmem:[#allocation2 + $0x10] sm:$0xff] }
 0x174   : > { %1010 = vst.msk [vmem:[#allocation2 + $0x18] sm:$0xff] %vm419_vm0, %v993_v16  ;;  %v1179_v21 = vsub.f32 %v1035_v15, %v1163_v17  ;;  %v1156_v22 = vmul.f32 %v1893_v19, %v1044_v20  ;;  %v931_v27 = vpop.f32.mrf.mxu2  ;;  %v1036_v19 = vld [vmem:[%s1904_s30 + $0x50] sm:$0xff] }
 0x175   : > { %v977_v63 = vpop.f32.mrf.mxu3  ;;  %v882_v15 = vld [vmem:[#allocation2 + $0x30] sm:$0xff] }
 0x176   : > { %v978_v40 = vadd.f32 %v977_v63, %v928_v3  ;;  %v1195_v26 = vand.u32 2147483647, %v1179_v21  ;;  %v1172_v34 = vsub.f32 %v1028_v24, %v1156_v22  ;;  %v913_v41 = vpop.f32.mrf.mxu0  ;;  %v1137_v22 = vpop.permute.xlu2 %1136 }
 0x177   : > { %v960_v29 = vpop.f32.mrf.mxu1 }
 0x178   : > { %v1001_v33 = vadd.f32 %v978_v40, %v887_v23  ;;  %v961_v1 = vadd.f32 %v960_v29, %v911_v13  ;;  %v1229_v56 = vsel %vm419_vm0, %v1195_v26, 0.0  ;;  %v1188_v45 = vand.u32 2147483647, %v1172_v34 }
 0x179   : > { %1206 = vadd.xlane.f32.xlu1 %v1205_v31  ;;  %1230 = vadd.xlane.f32.xlu2 %v1229_v56  ;;  %v1052_v37 = vld [vmem:[#allocation2 + $0x50] sm:$0xff] }
 0x17a   : > { %1018 = vst.msk [vmem:[#allocation2 + $0x58] sm:$0xff] %vm419_vm0, %v1001_v33  ;;  %v994_v38 = vadd.f32 %v961_v1, %v880_v28  ;;  %v1164_v39 = vmul.f32 %v1127_v36, %v1052_v37  ;;  %v1208_v58 = vsel %vm419_vm0, %v1188_v45, 0.0  ;;  %v890_v33 = vld [vmem:[#allocation2 + $0x70] sm:$0xff]  ;;  %v883_v37 = vld [vmem:[#allocation2 + $0x38] sm:$0xff] }
 0x17b   : > { %v1045_v42 = vld [vmem:[#allocation2 + $0x18] sm:$0xff] }
 0x17c   : > { %1011 = vst.msk [vmem:[#allocation2 + $0x20] sm:$0xff] %vm419_vm0, %v994_v38  ;;  %v1180_v44 = vsub.f32 %v1036_v19, %v1164_v39  ;;  %v1157_v49 = vmul.f32 %v1895_v25, %v1045_v42  ;;  %v933_v61 = vpop.f32.mrf.mxu2  ;;  %v1037_v25 = vld [vmem:[%s1904_s30 + $0x58] sm:$0xff] }
 0x17d   : > { %v980_v50 = vpop.f32.mrf.mxu3 }
 0x17e   : > { %v981_v32 = vadd.f32 %v980_v50, %v931_v27  ;;  %v1196_v51 = vand.u32 2147483647, %v1180_v44  ;;  %v1173_v54 = vsub.f32 %v1029_v46, %v1157_v49  ;;  %v916_v60 = vpop.f32.mrf.mxu0  ;;  %v1031_v27 = vld [vmem:[%s1904_s30 + $0x28] sm:$0xff]  ;;  %v1032_v46 = vld [vmem:[%s1904_s30 + $0x30] sm:$0xff] }
 0x17f   : > { %v962_v53 = vpop.f32.mrf.mxu1 }
 0x180   : > { %v1002_v55 = vadd.f32 %v981_v32, %v888_v47  ;;  %v963_v52 = vadd.f32 %v962_v53, %v913_v41  ;;  %v1232_v57 = vsel %vm419_vm0, %v1196_v51, 0.0  ;;  %v1189_v3 = vand.u32 2147483647, %v1173_v54  ;;  %v891_v32 = vld [vmem:[#allocation2 + $0x78] sm:$0xff] }
 0x181   : > { %1233 = vadd.xlane.f32.xlu0 %v1232_v57  ;;  %1209 = vadd.xlane.f32.xlu2 %v1208_v58  ;;  %v1053_v62 = vld [vmem:[#allocation2 + $0x58] sm:$0xff]  ;;  %v1040_v57 = vld [vmem:[%s1904_s30 + $0x70] sm:$0xff] }
 0x182   : > { %1019 = vst.msk [vmem:[#allocation2 + $0x60] sm:$0xff] %vm419_vm0, %v1002_v55  ;;  %v995_v0 = vadd.f32 %v963_v52, %v881_v35  ;;  %v1165_v2 = vmul.f32 %v1132_v59, %v1053_v62  ;;  %v1211_v16 = vsel %vm419_vm0, %v1189_v3, 0.0  ;;  %v1147_v52 = vpop.permute.xlu1 %1146  ;;  %v1142_v3 = vpop.permute.xlu0 %1141 }
 0x183   : > { %v1046_v5 = vld [vmem:[#allocation2 + $0x20] sm:$0xff] }
 0x184   : > { %1012 = vst.msk [vmem:[#allocation2 + $0x28] sm:$0xff] %vm419_vm0, %v995_v0  ;;  %v1181_v7 = vsub.f32 %v1037_v25, %v1165_v2  ;;  %v1158_v8 = vmul.f32 %v1909_v48, %v1046_v5  ;;  %v1038_v48 = vld [vmem:[%s1904_s30 + $0x60] sm:$0xff]  ;;  %v936_v26 = vpop.f32.mrf.mxu2  ;;  %v1033_v25 = vld [vmem:[%s1904_s30 + $0x38] sm:$0xff] }
 0x185   : > { %v982_v10 = vpop.f32.mrf.mxu3 }
 0x186   : > { %v983_v11 = vadd.f32 %v982_v10, %v933_v61  ;;  %v1197_v12 = vand.u32 2147483647, %v1181_v7  ;;  %v1174_v13 = vsub.f32 %v1030_v4, %v1158_v8  ;;  %v918_v19 = vpop.f32.mrf.mxu0  ;;  %v1039_v8 = vld [vmem:[%s1904_s30 + $0x68] sm:$0xff]  ;;  %v1152_v10 = vpop.permute.xlu2 %1151 }
 0x187   : > { %v965_v14 = vpop.f32.mrf.mxu1 }
 0x188   : > { %v1003_v17 = vadd.f32 %v983_v11, %v889_v9  ;;  %v966_v18 = vadd.f32 %v965_v14, %v916_v60  ;;  %v1235_v20 = vsel %vm419_vm0, %v1197_v12, 0.0  ;;  %v1190_v21 = vand.u32 2147483647, %v1174_v13  ;;  %v1041_v11 = vld [vmem:[%s1904_s30 + $0x78] sm:$0xff] }
 0x189   : > { %1236 = vadd.xlane.f32.xlu1 %v1235_v20  ;;  %1212 = vadd.xlane.f32.xlu2 %v1211_v16  ;;  %v1054_v23 = vld [vmem:[#allocation2 + $0x60] sm:$0xff] }
 0x18a   : > { %1020 = vst.msk [vmem:[#allocation2 + $0x68] sm:$0xff] %vm419_vm0, %v1003_v17  ;;  %v996_v63 = vadd.f32 %v966_v18, %v882_v15  ;;  %v1214_v24 = vsel %vm419_vm0, %v1190_v21, 0.0  ;;  %v1166_v40 = vmul.f32 %v1137_v22, %v1054_v23 }
 0x18b   : > { %1215 = vadd.xlane.f32.xlu0 %v1214_v24  ;;  %v1047_v28 = vld [vmem:[#allocation2 + $0x28] sm:$0xff] }
 0x18c   : > { %1013 = vst.msk [vmem:[#allocation2 + $0x30] sm:$0xff] %vm419_vm0, %v996_v63  ;;  %v1182_v29 = vsub.f32 %v1038_v48, %v1166_v40  ;;  %v1159_v31 = vmul.f32 %v1898_v30, %v1047_v28  ;;  %v938_v50 = vpop.f32.mrf.mxu2 }
 0x18d   : > { %v985_v1 = vpop.f32.mrf.mxu3 }
 0x18e   : > { %v986_v56 = vadd.f32 %v985_v1, %v936_v26  ;;  %v1198_v34 = vand.u32 2147483647, %v1182_v29  ;;  %v1175_v36 = vsub.f32 %v1031_v27, %v1159_v31 }
 0x18f   : > { %v967_v38 = vpop.f32.mrf.mxu1 }
 0x190   : > { %v1004_v39 = vadd.f32 %v986_v56, %v890_v33  ;;  %v968_v41 = vadd.f32 %v967_v38, %v918_v19  ;;  %v1238_v42 = vsel %vm419_vm0, %v1198_v34, 0.0  ;;  %v1191_v44 = vand.u32 2147483647, %v1175_v36 }
 0x191   : > { %1239 = vadd.xlane.f32.xlu2 %v1238_v42  ;;  %v1055_v62 = vld [vmem:[#allocation2 + $0x68] sm:$0xff] }
 0x192   : > { %1021 = vst.msk [vmem:[#allocation2 + $0x70] sm:$0xff] %vm419_vm0, %v1004_v39  ;;  %v997_v45 = vadd.f32 %v968_v41, %v883_v37  ;;  %v1217_v30 = vsel %vm419_vm0, %v1191_v44, 0.0  ;;  %v1167_v7 = vmul.f32 %v1142_v3, %v1055_v62 }
 0x193   : > { %1218 = vadd.xlane.f32.xlu1 %v1217_v30  ;;  %v1048_v49 = vld [vmem:[#allocation2 + $0x30] sm:$0xff] }
 0x194   : > { %1014 = vst.msk [vmem:[#allocation2 + $0x38] sm:$0xff] %vm419_vm0, %v997_v45  ;;  %v1160_v47 = vmul.f32 %v1911_v43, %v1048_v49  ;;  %v1183_v14 = vsub.f32 %v1039_v8, %v1167_v7 }
 0x195   : > { %v987_v51 = vpop.f32.mrf.mxu3 }
 0x196   : > { %v988_v35 = vadd.f32 %v987_v51, %v938_v50  ;;  %v1176_v53 = vsub.f32 %v1032_v46, %v1160_v47  ;;  %v1199_v17 = vand.u32 2147483647, %v1183_v14 }
 0x198   : > { %v1005_v54 = vadd.f32 %v988_v35, %v891_v32  ;;  %v1192_v55 = vand.u32 2147483647, %v1176_v53  ;;  %v1241_v20 = vsel %vm419_vm0, %v1199_v17, 0.0 }
 0x199   : > { %v1056_v58 = vld [vmem:[#allocation2 + $0x70] sm:$0xff] }
 0x19a   : > { %1022 = vst.msk [vmem:[#allocation2 + $0x78] sm:$0xff] %vm419_vm0, %v1005_v54  ;;  %v1220_v59 = vsel %vm419_vm0, %v1192_v55, 0.0  ;;  %v1168_v61 = vmul.f32 %v1147_v52, %v1056_v58 }
 0x19b   : > { %1221 = vadd.xlane.f32.xlu2 %v1220_v59  ;;  %v1049_v43 = vld [vmem:[#allocation2 + $0x38] sm:$0xff] }
 0x19c   : > { %v1184_v0 = vsub.f32 %v1040_v57, %v1168_v61  ;;  %v1161_v2 = vmul.f32 %v1918_v6, %v1049_v43 }
 0x19e   : > { %v1200_v4 = vand.u32 2147483647, %v1184_v0  ;;  %v1177_v5 = vsub.f32 %v1033_v25, %v1161_v2 }
 0x1a0   : > { %v1244_v60 = vsel %vm419_vm0, %v1200_v4, 0.0  ;;  %v1193_v9 = vand.u32 2147483647, %v1177_v5 }
 0x1a1   : > { %1245 = vadd.xlane.f32.xlu1 %v1244_v60  ;;  %v1057_v12 = vld [vmem:[#allocation2 + $0x78] sm:$0xff] }
 0x1a2   : > { %v1223_v13 = vsel %vm419_vm0, %v1193_v9, 0.0  ;;  %v1169_v15 = vmul.f32 %v1152_v10, %v1057_v12 }
 0x1a3   : > { %1224 = vadd.xlane.f32.xlu0 %v1223_v13 }
 0x1a4   : > { %v1185_v16 = vsub.f32 %v1041_v11, %v1169_v15 }
 0x1a6   : > { %v1201_v6 = vand.u32 2147483647, %v1185_v16 }
 0x1a8   : > { %v1247_v18 = vsel %vm419_vm0, %v1201_v6, 0.0 }
 0x1a9   : > { %1248 = vadd.xlane.f32.xlu2 %v1247_v18 }
 0x1ab   : > { %1242 = vadd.xlane.f32.xlu0 %v1241_v20 }
 0x1de   : > { %v1204_v21 = vpop.xlane.xlu0 %1203 }
 0x1df   : > { %1251 = vst.msk [vmem:[%s1969_s21] sm:$0xff] %vm1250_vm1, %v1204_v21 }
 0x1e4   : > { %v1228_v22 = vpop.xlane.xlu1 %1227 }
 0x1e5   : > { %1259 = vst.msk [vmem:[%s1969_s21 + $0x40] sm:$0xff] %vm1250_vm1, %v1228_v22 }
 0x1ec   : > { %v1207_v48 = vpop.xlane.xlu1 %1206  ;;  %v1231_v23 = vpop.xlane.xlu2 %1230 }
 0x1ed   : > { %1252 = vst.msk [vmem:[%s1969_s21 + $0x8] sm:$0xff] %vm1250_vm1, %v1207_v48 }
 0x1ee   : > { %1260 = vst.msk [vmem:[%s1969_s21 + $0x48] sm:$0xff] %vm1250_vm1, %v1231_v23 }
 0x1f4   : > { %v1234_v63 = vpop.xlane.xlu0 %1233  ;;  %v1210_v24 = vpop.xlane.xlu2 %1209 }
 0x1f5   : > { %1261 = vst.msk [vmem:[%s1969_s21 + $0x50] sm:$0xff] %vm1250_vm1, %v1234_v63 }
 0x1f6   : > { %1253 = vst.msk [vmem:[%s1969_s21 + $0x10] sm:$0xff] %vm1250_vm1, %v1210_v24 }
 0x1fc   : > { %v1237_v40 = vpop.xlane.xlu1 %1236  ;;  %v1213_v26 = vpop.xlane.xlu2 %1212 }
 0x1fd   : > { %1262 = vst.msk [vmem:[%s1969_s21 + $0x58] sm:$0xff] %vm1250_vm1, %v1237_v40 }
 0x1fe   : > { %1254 = vst.msk [vmem:[%s1969_s21 + $0x18] sm:$0xff] %vm1250_vm1, %v1213_v26  ;;  %v1216_v27 = vpop.xlane.xlu0 %1215 }
 0x1ff   : > { %1255 = vst.msk [vmem:[%s1969_s21 + $0x20] sm:$0xff] %vm1250_vm1, %v1216_v27 }
 0x204   : > { %v1240_v28 = vpop.xlane.xlu2 %1239 }
 0x205   : > { %1263 = vst.msk [vmem:[%s1969_s21 + $0x60] sm:$0xff] %vm1250_vm1, %v1240_v28 }
 0x206   : > { %v1219_v29 = vpop.xlane.xlu1 %1218 }
 0x207   : > { %1256 = vst.msk [vmem:[%s1969_s21 + $0x28] sm:$0xff] %vm1250_vm1, %v1219_v29 }
 0x20e   : > { %v1222_v31 = vpop.xlane.xlu2 %1221 }
 0x20f   : > { %1257 = vst.msk [vmem:[%s1969_s21 + $0x30] sm:$0xff] %vm1250_vm1, %v1222_v31 }
 0x214   : > { %v1246_v33 = vpop.xlane.xlu1 %1245 }
 0x215   : > { %1265 = vst.msk [vmem:[%s1969_s21 + $0x70] sm:$0xff] %vm1250_vm1, %v1246_v33 }
 0x216   : > { %v1225_v1 = vpop.xlane.xlu0 %1224 }
 0x217   : > { %1258 = vst.msk [vmem:[%s1969_s21 + $0x38] sm:$0xff] %vm1250_vm1, %v1225_v1 }
 0x21c   : > { %v1249_v56 = vpop.xlane.xlu2 %1248 }
 0x21d   : > { %1266 = vst.msk [vmem:[%s1969_s21 + $0x78] sm:$0xff] %vm1250_vm1, %v1249_v56 }
 0x21e   : > { %v1243_v34 = vpop.xlane.xlu0 %1242 }
 0x21f   : > { %1264 = vst.msk [vmem:[%s1969_s21 + $0x68] sm:$0xff] %vm1250_vm1, %v1243_v34 }
 0x220 PF: > { %s16_s23 = sadd.s32 1, %s1500_s23   ;;  %s2019_s21 = smov %s1496_s22 }
 0x221   : > { %p13_p6 = scmp.ge.s32.totalorder %s16_s23, 4   ;;  %s2020_s22 = smov %s2022_s24 }
 0x223   :  { %15 = sbr.rel (!%p13_p6) target bundleno = 2 (0x2), region = 97 }

</bundles_post_ra>
